<compile_context>
chip_gen: v5e
topology: v5e:2x2
jax: 0.10.0
libtpu: 0.0.40
codegen_flags: <defaults>
</compile_context>

<pallas_src>
import math

import jax
import jax.numpy as jnp
from jax.experimental import pallas as pl
from jax.experimental.pallas import tpu as pltpu


def _pe_add_kernel(x_ref, pe_ref, out_ref):
    # Shapes per path (pe broadcasts over the leading batch dim where present):
    #   folded 3-D: x/out (B, TS, D), pe (TS, D)
    #   split  3-D: x/out (TS, D),    pe (TS, D)    (batch dim squeezed)
    #   flat   2-D: x/out (B, TC),    pe (1, TC)
    out_ref[...] = x_ref[...] + pe_ref[...]


def make_positional_encoding_table(max_len, d_model, dtype=jnp.float32):
    """The buffer built in PositionalEncoding.__init__ -> shape (max_len, d_model)."""
    position = jnp.arange(max_len, dtype=jnp.float32)[:, None]                      # (max_len, 1)
    div_term = jnp.exp(
        jnp.arange(0, d_model, 2, dtype=jnp.float32) * (-(math.log(10000.0) / d_model))
    )                                                                               # ((d_model+1)//2,)
    angles = position * div_term[None, :]                                           # (max_len, (d_model+1)//2)
    pe = jnp.zeros((max_len, d_model), dtype=jnp.float32)
    pe = pe.at[:, 0::2].set(jnp.sin(angles))
    pe = pe.at[:, 1::2].set(jnp.cos(angles[:, : d_model // 2]))                     # odd d_model safe
    return pe.astype(dtype)


def _round_up(x, m):
    return ((x + m - 1) // m) * m


def _vmem_budget():
    """Generation-aware (tile_budget_bytes, scoped_vmem_limit_bytes)."""
    try:
        cap = int(pltpu.get_tpu_info().vmem_capacity_bytes)
    except Exception:
        cap = 64 * 1024 * 1024                       # conservative: fits v7x's 64 MiB too
    limit = min((cap * 3) // 4, 96 * 1024 * 1024)    # ~48 MiB on v7x, ~96 MiB on v5e/v6e
    return limit // 2, limit


def _pick_seq_tile(S, row_bytes, budget):
    """Largest 8-aligned seq tile under `budget`; capped so large S still yields >=~8 steps."""
    ts = max(8, (budget // max(row_bytes, 1)) // 8 * 8)
    ts = min(ts, 2048, _round_up(S, 8))
    if S >= 64 and ts * 8 > _round_up(S, 8):         # keep >= ~8 grid steps (v7x megacore)
        ts = max(8, _round_up(pl.cdiv(S, 8), 8))
    return ts


def _pick_flat_tile(total, col_bytes, budget):
    """Largest 128-aligned tile of the flattened (S*d_model) axis under `budget`."""
    if total < 128:
        return total                                  # block dim == full array dim is legal
    tc = max(128, (budget // max(col_bytes, 1)) // 128 * 128)
    return min(tc, (total // 128) * 128, 512 * 1024)


def positional_encoding(x, pe):
    """x: (B, S, d_model); pe: (max_len, d_model) table.

    Returns x + pe[:S] (dropout = identity / eval mode).  The add happens in x.dtype
    (pe pre-cast in the wrapper) — this is the intended inference numeric behavior.
    """
    B, S, D = x.shape
    max_len, D_pe = pe.shape
    assert D_pe == D and max_len >= S

    itemsize = jnp.dtype(x.dtype).itemsize
    budget, vmem_limit = _vmem_budget()
    cost = pl.CostEstimate(
        flops=B * S * D,
        transcendentals=0,
        bytes_accessed=(2 * B * S * D + S * D) * itemsize,
    )

    if D % 128 == 0:
        # d_model already lane-dense.  Pass the FULL pe table (no pe[:S] HBM pass);
        # only slice-and-cast when the dtypes actually differ.
        pe_in = pe if pe.dtype == x.dtype else pe[:S].astype(x.dtype)

        folded_row_bytes = 2 * (2 * B + 1) * D * itemsize   # x + out + pe rows, double-buffered
        if 8 * folded_row_bytes <= budget:
            # Fold the batch into the block: fewer, fatter grid steps.
            ts = _pick_seq_tile(S, folded_row_bytes, budget)
            grid = (pl.cdiv(S, ts),)
            in_specs = [
                pl.BlockSpec((B, ts, D), lambda s: (0, s, 0)),      # x
                pl.BlockSpec((ts, D), lambda s: (s, 0)),            # pe (broadcast over batch)
            ]
            out_spec = pl.BlockSpec((B, ts, D), lambda s: (0, s, 0))
            dims = ("parallel",)
        else:
            # Batch too large to fold: (seq, batch) grid; seq outer so the shared pe
            # tile index is unchanged across the inner batch steps (no re-DMA).
            split_row_bytes = 2 * 3 * D * itemsize
            ts = _pick_seq_tile(S, split_row_bytes, budget)
            grid = (pl.cdiv(S, ts), B)
            in_specs = [
                pl.BlockSpec((None, ts, D), lambda s, b: (b, s, 0)),
                pl.BlockSpec((ts, D), lambda s, b: (s, 0)),
            ]
            out_spec = pl.BlockSpec((None, ts, D), lambda s, b: (b, s, 0))
            dims = ("parallel", "parallel")

        return pl.pallas_call(
            _pe_add_kernel,
            out_shape=jax.ShapeDtypeStruct((B, S, D), x.dtype),
            grid=grid,
            in_specs=in_specs,
            out_specs=out_spec,
            compiler_params=pltpu.CompilerParams(
                dimension_semantics=dims, vmem_limit_bytes=vmem_limit),
            cost_estimate=cost,
        )(x, pe_in)

    # d_model not a multiple of 128 (e.g. D < 128): flatten to a lane-dense 2-D layout
    # so output stores are unmasked vst instead of masked vst.msk partial stores.
    total = S * D
    x_flat = x.reshape(B, total)
    pe_flat = pe[:S].astype(x.dtype).reshape(1, total)   # slice required to align flat indices

    col_bytes = 2 * (2 * B + 1) * itemsize
    tc = _pick_flat_tile(total, col_bytes, budget)
    grid = (pl.cdiv(total, tc),)

    out_flat = pl.pallas_call(
        _pe_add_kernel,
        out_shape=jax.ShapeDtypeStruct((B, total), x.dtype),
        grid=grid,
        in_specs=[
            pl.BlockSpec((B, tc), lambda c: (0, c)),
            pl.BlockSpec((1, tc), lambda c: (0, c)),
        ],
        out_specs=pl.BlockSpec((B, tc), lambda c: (0, c)),
        compiler_params=pltpu.CompilerParams(
            dimension_semantics=("parallel",), vmem_limit_bytes=vmem_limit),
        cost_estimate=cost,
    )(x_flat, pe_flat)
    return out_flat.reshape(B, S, D)


if __name__ == "__main__":
    # Shapes consistent with the module forward: (batch, seq, d_model).
    B, S, d_model = 2, 8, 32
    dropout_p = 0.1   # nn.Dropout: identity in eval mode (inference semantics implemented)
    max_len = 10000   # module default

    key = jax.random.PRNGKey(0)
    k0, k1 = jax.random.split(key)

    x = jax.random.normal(k0, (B, S, d_model), dtype=jnp.float32)
    pe = make_positional_encoding_table(max_len, d_model, dtype=x.dtype)

    out = positional_encoding(x, pe)
    jax.block_until_ready(out)
    ref = x + pe[None, :S, :]
    assert out.shape == (B, S, d_model)
    assert jnp.allclose(out, ref, atol=1e-6, rtol=1e-6)

    # Also exercise the lane-aligned (d_model % 128 == 0) path: full pe table passed
    # (no pe[:S] slice) and the batch-folded grid.
    B2, S2, D2 = 2, 16, 128
    x2 = jax.random.normal(k1, (B2, S2, D2), dtype=jnp.float32)
    pe2 = make_positional_encoding_table(max_len, D2, dtype=x2.dtype)
    out2 = positional_encoding(x2, pe2)
    jax.block_until_ready(out2)
    ref2 = x2 + pe2[None, :S2, :]
    assert jnp.allclose(out2, ref2, atol=1e-6, rtol=1e-6)

    print("KERNEL_OK")
</pallas_src>

<mosaic_0001>
module attributes {stable_mosaic.version = 11 : i64} {
  func.func @_pe_add_kernel(%arg0: i32, %arg1: memref<2x256xf32, #tpu.memory_space<vmem>>, %arg2: memref<1x256xf32, #tpu.memory_space<vmem>>, %arg3: memref<2x256xf32, #tpu.memory_space<vmem>>) attributes {dimension_semantics = [#tpu.dimension_semantics<parallel>], iteration_bounds = array<i64: 1>, scalar_prefetch = 0 : i64, scratch_operands = 0 : i64, tpu.core_type = #tpu.core_type<tc>, window_params = [{transform_indices = @transform_0, window_bounds = array<i64: 2, 256>}, {transform_indices = @transform_1, window_bounds = array<i64: 1, 256>}, {transform_indices = @transform_2, window_bounds = array<i64: 2, 256>}]} {
    %c0 = arith.constant 0 : index
    %c0_0 = arith.constant 0 : index
    %0 = vector.load %arg1[%c0, %c0_0] : memref<2x256xf32, #tpu.memory_space<vmem>>, vector<2x256xf32>
    %c0_1 = arith.constant 0 : index
    %c0_2 = arith.constant 0 : index
    %1 = vector.load %arg2[%c0_1, %c0_2] : memref<1x256xf32, #tpu.memory_space<vmem>>, vector<1x256xf32>
    %2 = vector.broadcast %1 : vector<1x256xf32> to vector<2x256xf32>
    %3 = arith.addf %0, %2 : vector<2x256xf32>
    %c0_3 = arith.constant 0 : index
    %c0_4 = arith.constant 0 : index
    %4 = vector.load %arg3[%c0_3, %c0_4] : memref<2x256xf32, #tpu.memory_space<vmem>>, vector<2x256xf32>
    tpu.vector_store %arg3[%c0_3, %c0_4], %3 {strides = array<i32>} : memref<2x256xf32, #tpu.memory_space<vmem>>, vector<2x256xf32>,
    return
  }
  func.func @transform_0(%arg0: i32) -> (i32, i32) {
    %c0_i32 = arith.constant 0 : i32
    %c0_i32_0 = arith.constant 0 : i32
    return %c0_i32, %arg0 : i32, i32
  }
  func.func @transform_1(%arg0: i32) -> (i32, i32) {
    %c0_i32 = arith.constant 0 : i32
    %c0_i32_0 = arith.constant 0 : i32
    return %c0_i32, %arg0 : i32, i32
  }
  func.func @transform_2(%arg0: i32) -> (i32, i32) {
    %c0_i32 = arith.constant 0 : i32
    %c0_i32_0 = arith.constant 0 : i32
    return %c0_i32, %arg0 : i32, i32
  }
}

</mosaic_0001>

<bundles_post_ra>
// kernel: tpu_custom_call.1
= control target key start
LH: loop header
LB: loop body
LE: loop exit
PB: predicated region body
PF: predicated region fallthrough
CT: control target
= control target key end

     0   :  { %7 = vsyncpa [#allocation3], 0  ;;  %s177_s0 = inlined_call_operand.hbm [shape: f32[2,256], index: 0, kind: input, shape index: {}]   ;;  %s178_s1 = inlined_call_operand.hbm [shape: f32[1,256], index: 1, kind: input, shape index: {}]   ;;  %s179_s2 = inlined_call_operand.hbm [shape: f32[2,256], index: 2, kind: output, shape index: {}]  }
   0x1   :  { %8 = vsyncpa [#allocation6], 0 }
   0x2   :  { %9 = vsyncpa [#allocation4], 0  ;;  %s15_s11 = sshll.u32 %s177_s0, 4  ;;  %s150_s12 = smov [#allocation2]   ;;  %s16_s11 = int_to_ptr.hbm [resolvable:$true] %s15_s11 }
   0x3   :  { %s17_s13 = sshll.u32 %s150_s12, 4  ;;  %s26_s16 = sshll.u32 %s178_s1, 4  ;;  %s18_s13 = int_to_ptr.vmem [resolvable:$true] %s17_s13  ;;  %s27_s16 = int_to_ptr.hbm [resolvable:$true] %s26_s16 }
   0x4   :  { %20 = dma.hbm_to_vmem [thread:$0]  %s16_s11, 64, %s18_s13, [#allocation3]  }
   0x5   :  { %s151_s17 = smov [#allocation5]  }
   0x6   :  { %s28_s18 = sshll.u32 %s151_s17, 4  ;;  %s29_s18 = int_to_ptr.vmem [resolvable:$true] %s28_s18 }
   0x7   :  { %31 = dma.hbm_to_vmem [thread:$0]  %s27_s16, 32, %s29_s18, [#allocation6]  }
   0x8   :  { %144 = dma.done.wait [#allocation3], 64  }
   0x9   :  { %145 = vsyncadd [#allocation3], 4294967232 }
   0xa   :  { %146 = dma.done.wait [#allocation6], 32  }
   0xb   :  { %147 = vsyncadd [#allocation6], 4294967264  ;;  %v41_v0 = vld [vmem:[#allocation5] sm:$0x3]  ;;  %vm46_vm0 = vcmask 1041408   ;;  %s152_s0 = smov [#allocation7]  }
   0xc   :  { %v43_v1 = vperm.slane %v41_v0, 0  ;;  %v44_v2 = vperm.slane %v41_v0, 1  ;;  %v40_v3 = vld [vmem:[#allocation2] sm:$0xf]  ;;  %s56_s19 = sshll.u32 %s152_s0, 4  ;;  %s58_s21 = sshll.u32 %s179_s2, 4  ;;  %s57_s19 = int_to_ptr.vmem [resolvable:$true] %s56_s19  ;;  %s59_s21 = int_to_ptr.hbm [resolvable:$true] %s58_s21 }
   0xe   :  { %v45_v4 = vrot.slane %v44_v2, 6 }
  0x10   :  { %v47_v5 = vsel %vm46_vm0, %v43_v1, %v45_v4 }
  0x11   :  { %v49_v6 = vadd.f32 %v47_v5, %v40_v3 }
  0x13   :  { %50 = vst [vmem:[#allocation7] sm:$0xf] %v49_v6 }
  0x14   :  { %61 = dma.vmem_to_hbm [thread:$0]  %s57_s19, 64, %s59_s21, [#allocation4]  }
  0x15   :  { %148 = dma.done.wait [#allocation4], 64  }
  0x16   :  { %149 = vsyncadd [#allocation4], 4294967232 }
  0x17   :  { %66 = vsyncpa [#allocation3], 1 }
  0x18   :  { %67 = vsyncpa [#allocation6], 1 }
  0x19   :  { %68 = vsyncpa [#allocation4], 1 }

</bundles_post_ra>
